<compile_context>
chip_gen: v7x
topology: tpu7x:2x2x1
jax: 0.10.0
libtpu: 0.0.40
codegen_flags: <defaults>
</compile_context>

<pallas_src>
import functools

import jax
import jax.numpy as jnp
from jax.experimental import pallas as pl
from jax.experimental.pallas import tpu as pltpu


def _round_up(x, m):
    return ((x + m - 1) // m) * m


def _tensorcores_per_chip():
    """Best-effort count of TensorCores driven by a single pallas_call."""
    try:
        kind = jax.devices()[0].device_kind.lower()
    except Exception:
        return 1
    # v7x exposes 2 TensorCores per chip (sharded via the "parallel" grid
    # axis); v5e / v6e are single-TC.  Unknown kinds: don't force a split.
    return 2 if "v7" in kind else 1


def _svm_kernel(x_ref, w_ref, b_ref, o_ref, *, tf, n_feat, mask_feat,
                whole_weight):
    """Grid point (b, k): x tile (TB, TF); weight row (whole or per-tile)."""
    k = pl.program_id(1)

    # Bias folded into the accumulator init (no epilogue RMW of the block).
    @pl.when(k == 0)
    def _():
        o_ref[...] = jnp.full(o_ref.shape, b_ref[0], o_ref.dtype)

    if whole_weight:
        # Whole (zero-padded) weight row is VMEM-resident (constant index_map,
        # fetched once); slice the current feature tile out of it.
        w = w_ref[:, pl.ds(pl.multiple_of(k * tf, 128), tf)]
    else:
        w = w_ref[...]

    # Lane-dense VPU multiply + XLU cross-lane reduce (kernel is HBM-bound, so
    # this compute is free and keeps all loads lane-dense).
    prod = x_ref[...].astype(jnp.float32) * w

    if mask_feat:
        # Ragged final feature tile: zero out lanes beyond the true n_features
        # (also neutralizes any garbage read from the out-of-bounds region).
        col = k * tf + jax.lax.broadcasted_iota(jnp.int32, prod.shape, 1)
        prod = jnp.where(col < n_feat, prod, 0.0)

    o_ref[...] += jnp.sum(prod, axis=-1, keepdims=True)


def linear_svm_forward(x, weight, bias, *, tb=256, tf=8192,
                       min_batch_tiles=None, vmem_limit_bytes=None):
    """Pallas forward for LinearSVMPyTorch:  x @ W.T + b.

    Args:
      x:      (batch, n_features) float32 (bf16 also accepted; upcast in-kernel)
      weight: (1, n_features)     float32  (PyTorch nn.Linear layout)
      bias:   (1,)                float32
      tb, tf: requested batch / feature tile sizes (balanced + aligned
              internally; arbitrary shapes handled without padding x).
      min_batch_tiles: force at least this many batch tiles (defaults to 2 on
              dual-TC chips such as v7x, else 1).
      vmem_limit_bytes: scoped VMEM limit; computed from actual usage if None.

    Returns:
      (batch, 1) float32
    """
    x = jnp.asarray(x)
    if x.dtype not in (jnp.float32, jnp.bfloat16):
        x = x.astype(jnp.float32)
    weight = jnp.asarray(weight, jnp.float32)
    bias = jnp.asarray(bias, jnp.float32).reshape((1,))

    b_sz, n_feat = x.shape
    assert weight.shape == (1, n_feat)

    xbytes = 2 if x.dtype == jnp.bfloat16 else 4
    sub = 16 if x.dtype == jnp.bfloat16 else 8   # sublane alignment

    # ---- balanced batch tiling (waste bounded to < one sublane group) ----
    tb = max(sub, _round_up(min(tb, _round_up(b_sz, sub)), sub))
    tiles_b = pl.cdiv(b_sz, tb)
    if min_batch_tiles is None:
        min_batch_tiles = 2 if _tensorcores_per_chip() >= 2 else 1
    if b_sz >= 2 * sub and tiles_b < min_batch_tiles:
        tiles_b = min_batch_tiles          # keep both v7x TensorCores busy
    tb = _round_up(pl.cdiv(b_sz, tiles_b), sub)
    tiles_b = pl.cdiv(b_sz, tb)

    # ---- balanced feature tiling (waste bounded to < 128 lanes) ----
    tf = max(128, _round_up(min(tf, _round_up(n_feat, 128)), 128))
    tiles_f = pl.cdiv(n_feat, tf)
    tf = _round_up(pl.cdiv(n_feat, tiles_f), 128)
    tiles_f = pl.cdiv(n_feat, tf)

    pf = tiles_f * tf
    mask_feat = (n_feat % tf) != 0

    # Only the tiny weight row is ever padded (so in-kernel slices of the
    # whole-row buffer stay in bounds); x and the output are never copied.
    if pf != n_feat:
        weight = jnp.pad(weight, ((0, 0), (0, pf - n_feat)))

    whole_weight = (pf * 4) <= (4 << 20)   # keep full row VMEM-resident if small
    if whole_weight:
        w_spec = pl.BlockSpec((1, pf), lambda b, k: (0, 0))
    else:
        w_spec = pl.BlockSpec((1, tf), lambda b, k: (0, k))

    if vmem_limit_bytes is None:
        vmem_limit_bytes = (2 * tb * tf * xbytes                      # x (2 bufs)
                            + (2 * pf * 4 if whole_weight else 4 * tf * 4)
                            + 2 * tb * 4                              # out acc
                            + (8 << 20))                              # headroom

    kernel = functools.partial(_svm_kernel, tf=tf, n_feat=n_feat,
                               mask_feat=mask_feat, whole_weight=whole_weight)

    return pl.pallas_call(
        kernel,
        out_shape=jax.ShapeDtypeStruct((b_sz, 1), jnp.float32),
        grid_spec=pltpu.PrefetchScalarGridSpec(
            num_scalar_prefetch=0,
            grid=(tiles_b, tiles_f),
            in_specs=[
                # x: (TB, TF) tile at (batch tile b, feature tile k).
                pl.BlockSpec((tb, tf), lambda b, k: (b, k)),
                # weight row: whole (constant) or per-feature-tile.
                w_spec,
                # bias: single scalar in SMEM, read once at k == 0.
                pl.BlockSpec(memory_space=pltpu.MemorySpace.SMEM),
            ],
            # Same output block across the reduction axis k -> VMEM-resident
            # accumulator; partial (ragged) batch blocks are written back
            # only over the valid rows.
            out_specs=pl.BlockSpec((tb, 1), lambda b, k: (b, 0)),
        ),
        compiler_params=pltpu.CompilerParams(
            dimension_semantics=("parallel", "arbitrary"),
            vmem_limit_bytes=vmem_limit_bytes,
        ),
        cost_estimate=pl.CostEstimate(
            flops=2 * b_sz * n_feat,
            transcendentals=0,
            bytes_accessed=b_sz * n_feat * xbytes + pf * 4 + b_sz * 4,
        ),
    )(x, weight, bias)


# TODO(synk): seed_model pickle loading / cprint in __init__ are host-side
# initialization, not part of the forward pass, so they are not translated.


if __name__ == "__main__":
    key = jax.random.PRNGKey(0)
    keys = jax.random.split(key, 9)

    def make_case(kx, kw, kb, batch, n_features):
        x = jax.random.normal(kx, (batch, n_features), dtype=jnp.float32)
        bound = 1.0 / (n_features ** 0.5)
        w = jax.random.uniform(kw, (1, n_features), minval=-bound,
                               maxval=bound, dtype=jnp.float32)
        b = jax.random.uniform(kb, (1,), minval=-bound, maxval=bound,
                               dtype=jnp.float32)
        return x, w, b

    # Case 1: aligned shapes, multi-tile grid in both axes.
    x1, w1, b1 = make_case(keys[0], keys[1], keys[2], 32, 1024)
    out1 = jax.block_until_ready(linear_svm_forward(x1, w1, b1, tb=16, tf=512))
    ref1 = x1 @ w1.T + b1
    assert out1.shape == (32, 1)
    assert jnp.allclose(out1, ref1, atol=1e-5, rtol=1e-5)

    # Case 2: unaligned shapes -> ragged batch + in-kernel feature masking
    # (no padded copy of x is ever made).
    x2, w2, b2 = make_case(keys[3], keys[4], keys[5], 10, 300)
    out2 = jax.block_until_ready(linear_svm_forward(x2, w2, b2, tb=8, tf=128))
    ref2 = x2 @ w2.T + b2
    assert out2.shape == (10, 1)
    assert jnp.allclose(out2, ref2, atol=1e-5, rtol=1e-5)

    # Case 3: default tile sizes, unaligned features, forced 2 batch tiles
    # (exercises the v7x dual-TensorCore split path on any chip).
    x3, w3, b3 = make_case(keys[6], keys[7], keys[8], 100, 2100)
    out3 = jax.block_until_ready(
        linear_svm_forward(x3, w3, b3, min_batch_tiles=2))
    ref3 = x3 @ w3.T + b3
    assert out3.shape == (100, 1)
    assert jnp.allclose(out3, ref3, atol=1e-5, rtol=1e-5)

    print("KERNEL_OK")
</pallas_src>

<mosaic_0001>
module attributes {stable_mosaic.version = 11 : i64} {
  func.func @_svm_kernel(%arg0: i32, %arg1: i32, %arg2: memref<16x512xf32, #tpu.memory_space<vmem>>, %arg3: memref<1x1024xf32, #tpu.memory_space<vmem>>, %arg4: memref<1xf32, #tpu.memory_space<smem>>, %arg5: memref<16x1xf32, #tpu.memory_space<vmem>>) attributes {dimension_semantics = [#tpu.dimension_semantics<parallel>, #tpu.dimension_semantics<arbitrary>], iteration_bounds = array<i64: 2, 2>, scalar_prefetch = 0 : i64, scratch_operands = 0 : i64, tpu.core_type = #tpu.core_type<tc>, window_params = [{transform_indices = @transform_0, window_bounds = array<i64: 16, 512>}, {pipeline_mode = #tpu.pipeline_mode<synchronous>, transform_indices = @transform_1, window_bounds = array<i64: 1, 1024>}, {transform_indices = @transform_2, window_bounds = array<i64: 1>}, {transform_indices = @transform_3, window_bounds = array<i64: 16, 1>}]} {
    %c0_i32 = arith.constant 0 : i32
    %0 = arith.cmpi eq, %arg1, %c0_i32 : i32
    %1 = arith.extui %0 : i1 to i32
    %c0_i32_0 = arith.constant 0 : i32
    %2 = arith.cmpi ne, %1, %c0_i32_0 : i32
    scf.if %2 {
      %c0_7 = arith.constant 0 : index
      %15 = memref.load %arg4[%c0_7] : memref<1xf32, #tpu.memory_space<smem>>
      %16 = vector.broadcast %15 : f32 to vector<16x1xf32>
      %c0_8 = arith.constant 0 : index
      %c0_9 = arith.constant 0 : index
      %17 = vector.load %arg5[%c0_8, %c0_9] : memref<16x1xf32, #tpu.memory_space<vmem>>, vector<16x1xf32>
      tpu.vector_store %arg5[%c0_8, %c0_9], %16 {strides = array<i32>} : memref<16x1xf32, #tpu.memory_space<vmem>>, vector<16x1xf32>,
    } else {
    }
    %c512_i32 = arith.constant 512 : i32
    %3 = arith.muli %arg1, %c512_i32 : i32
    %4 = tpu.assume_multiple %3, 128 : i32
    %c0 = arith.constant 0 : index
    %5 = arith.index_cast %4 : i32 to index
    %6 = vector.load %arg3[%c0, %5] : memref<1x1024xf32, #tpu.memory_space<vmem>>, vector<1x512xf32>
    %c0_1 = arith.constant 0 : index
    %c0_2 = arith.constant 0 : index
    %7 = vector.load %arg2[%c0_1, %c0_2] : memref<16x512xf32, #tpu.memory_space<vmem>>, vector<16x512xf32>
    %8 = vector.broadcast %6 : vector<1x512xf32> to vector<16x512xf32>
    %9 = arith.mulf %7, %8 : vector<16x512xf32>
    %c0_3 = arith.constant 0 : index
    %c0_4 = arith.constant 0 : index
    %10 = vector.load %arg5[%c0_3, %c0_4] : memref<16x1xf32, #tpu.memory_space<vmem>>, vector<16x1xf32>
    %cst = arith.constant dense<0.000000e+00> : vector<16xf32>
    %11 = vector.multi_reduction <add>, %9, %cst [1] : vector<16x512xf32> to vector<16xf32>
    %12 = vector.shape_cast %11 : vector<16xf32> to vector<16x1xf32>
    %13 = arith.addf %10, %12 : vector<16x1xf32>
    %c0_5 = arith.constant 0 : index
    %c0_6 = arith.constant 0 : index
    %14 = vector.load %arg5[%c0_5, %c0_6] : memref<16x1xf32, #tpu.memory_space<vmem>>, vector<16x1xf32>
    tpu.vector_store %arg5[%c0_5, %c0_6], %13 {strides = array<i32>} : memref<16x1xf32, #tpu.memory_space<vmem>>, vector<16x1xf32>,
    return
  }
  func.func @transform_0(%arg0: i32, %arg1: i32) -> (i32, i32) {
    %c0_i32 = arith.constant 0 : i32
    return %arg0, %arg1 : i32, i32
  }
  func.func @transform_1(%arg0: i32, %arg1: i32) -> (i32, i32) {
    %c0_i32 = arith.constant 0 : i32
    %c0_i32_0 = arith.constant 0 : i32
    %c0_i32_1 = arith.constant 0 : i32
    return %c0_i32, %c0_i32_0 : i32, i32
  }
  func.func @transform_2(%arg0: i32, %arg1: i32) -> i32 {
    %c0_i32 = arith.constant 0 : i32
    %c0_i32_0 = arith.constant 0 : i32
    return %c0_i32 : i32
  }
  func.func @transform_3(%arg0: i32, %arg1: i32) -> (i32, i32) {
    %c0_i32 = arith.constant 0 : i32
    %c0_i32_0 = arith.constant 0 : i32
    return %arg0, %c0_i32 : i32, i32
  }
}

</mosaic_0001>

<bundles_post_ra>
// kernel: tpu_custom_call.1
= control target key start
LH: loop header
LB: loop body
LE: loop exit
PB: predicated region body
PF: predicated region fallthrough
CT: control target
= control target key end

     0   :  { %s851_s0 = inlined_call_operand.hbm [shape: f32[32,1024], index: 0, kind: input, shape index: {}]   ;;  %s852_s1 = inlined_call_operand.hbm [shape: f32[1,1024], index: 1, kind: input, shape index: {}]   ;;  %s853_s2 = inlined_call_operand.<no memory space> [shape: f32[1], index: 2, kind: input, shape index: {}]   ;;  %s854_s3 = inlined_call_operand.vmem [shape: f32[32,1], index: 3, kind: output, shape index: {}]  }
   0x1   :  { %8 = sst [smem:[#allocation2]] %s853_s2 }
   0x2   :  { %9 = vsyncpa [#allocation4], 0 }
   0x3   :  { %11 = vsyncpa [#allocation4 + $0x1], 0 }
   0x4   :  { %12 = vsyncpa [#allocation6], 0  ;;  %s649_s14 = smov 0   ;;  %s651_s15 = smov 0  }
   0x5   :  { %s653_s16 = smov 0   ;;  %s655_s17 = smov 0  }
   0x6   :  { %s657_s18 = smov 0   ;;  %s659_s19 = smov 0  }
   0x7   :  { %s661_s20 = smov 0   ;;  %s663_s21 = smov 0  }
   0x8 LB: > { %s386_s2 = sadd.s32 4294967295, %s619_s21   ;;  %s39_s22 = sadd.s32 1, %s599_s16  ;;  %s619_s21 = sphi %s663_s21, %s18_s21   ;;  %s615_s20 = sphi %s661_s20, %s876_s20   ;;  %s611_s19 = sphi %s659_s19, %s875_s19   ;;  %s607_s18 = sphi %s657_s18, %s874_s18   ;;  %s603_s17 = sphi %s655_s17, %s873_s17   ;;  %s599_s16 = sphi %s653_s16, %s872_s16   ;;  %s595_s15 = sphi %s651_s15, %s871_s15   ;;  %s591_s14 = sphi %s649_s14, %s870_s14  }
   0x9   : > { %p46_p0 = scmp.ne.s32.totalorder %s599_s16, %s595_s15  ;;  %p47_p1 = scmp.eq.s32.totalorder %s619_s21, 0 }
   0xa   : > { %p52_p2 = scmp.ne.s32.totalorder %s595_s15, %s591_s14  ;;  %p693_p3 = scmp.eq.s32.totalorder %s386_s2, 0 }
   0xb   : > { %p48_p4 = por %p47_p1, %p46_p0  ;;  %p388_p5 = scmp.ge.s32.totalorder %s619_s21, 1 }
   0xc   : > { %s860_s23 = scalar_select %p693_p3, 1, 0 }
   0xd   : > { %p700_p6 = por %p693_p3, %p52_p2  ;;  %p131_p7 = scmp.lt.s32.totalorder %s619_s21, 5 }
   0xe   : > { %s621_s26 = smov [#allocation5]   ;;  %p421_p10 = scmp.lt.s32.totalorder %s619_s21, 4 }
   0xf   : > { %s861_s24 = scalar_select %p700_p6, 1, 0 }
  0x10   : > { %p705_p8 = pnand %p388_p5, %p131_p7  ;;  %s144_s27 = sshll.u32 %s621_s26, 4  ;;  %s145_s27 = int_to_ptr.vmem [resolvable:$true] %s144_s27 }
  0x11   : > { %p718_p12 = pnand %p421_p10, %p48_p4  ;;  %s491_s5 = scalar_lea.hbm %s852_s1, 128 }
  0x12   : > { %s862_s25 = scalar_select %p705_p8, 1, 0 }
  0x13   : > { %p412_p9 = pneg %p705_p8  ;;  %p492_p13 = scmp.ne.s32.totalorder %s852_s1, %s491_s5 }
  0x14   : > { %s864_s29 = scalar_select %p718_p12, 1, 0 }
  0x15   : > { %p714_p11 = pnand %p412_p9, %p693_p3  ;;  %p498_p5 = scmp.lt.u32.totalorder %s491_s5, %s852_s1 }
  0x17   : > { %p493_p0 = pneg %p714_p11 }
  0x19   : > { %p494_p1 = pnand %p493_p0, %p492_p13 }
  0x1b   : > { %p495_p2 = pneg %p494_p1 }
  0x1d   : > { %p500_p4 = pnand %p498_p5, %p495_p2 }
  0x1f   : > { %503 = shalt.err (!%p500_p4)
}
  0x20   : > { %s504_s10 = scalar_lea.vmem %s145_s27, 128  ;;  %p512_p3 = scmp.lt.s32.totalorder %s145_s27, %s145_s27 }
  0x21   : > { %p505_p7 = scmp.ne.s32.totalorder %s145_s27, %s504_s10  ;;  %p513_p6 = scmp.lt.s32.totalorder %s504_s10, %s504_s10 }
  0x23   : > { %p507_p9 = pnand %p505_p7, %p493_p0  ;;  %p514_p8 = por %p513_p6, %p512_p3 }
  0x25   : > { %p508_p10 = pneg %p507_p9 }
  0x27   : > { %p515_p12 = pnand %p514_p8, %p508_p10 }
  0x29   : > { %518 = shalt.err (!%p515_p12)
}
  0x2a   : > { %415 = dma.hbm_to_vmem [thread:$0]  (!%p714_p11), %s852_s1, 128, %s145_s27, [#allocation6]  }
  0x2b   : > { %s27_s13 = sadd.s32 1, %s611_s19  ;;  %s30_s14 = sadd.s32 1, %s615_s20 }
  0x2c   : > { %p28_p13 = scmp.ge.s32.totalorder %s27_s13, 2  ;;  %s158_s2 = sand.u32 1, %s599_s16  }
  0x2d   : > { %s391_s26 = sshll.u32 %s158_s2, 6  ;;  %s393_s30 = sshll.u32 %s611_s19, 2 }
  0x2e   : > { %s878_s13 = smov (%p28_p13, %s27_s13), 0  ;;  %s880_s14 = smov (!%p28_p13, %s30_s14), %s615_s20 }
  0x2f   : > { %s35_s28 = ssub.s32 %s611_s19, %s878_s13  ;;  %p32_p3 = scmp.ge.s32.totalorder %s880_s14, 2 }
  0x30   : > { %s405_s4 = sshll.u32 %s615_s20, 4  ;;  %s162_s5 = scalar_lea.vmem [#allocation3], %s391_s26 }
  0x31   : > { %s172_s27 = sshll.u32 %s162_s5, 4  ;;  %s882_s14 = smov (%p32_p3, %s880_s14), 0  ;;  %s750_s27 = int_to_ptr.vmem [resolvable:$true] %s172_s27 }
  0x32   : > { %s169_s6 = sadd.s32 %s405_s4, %s393_s30  ;;  %s34_s7 = ssub.s32 %s615_s20, %s882_s14 }
  0x33   : > { %s395_s8 = sshll.u32 %s169_s6, 7  ;;  %s36_s9 = sor.u32 %s35_s28, %s34_s7 }
  0x34   : > { %s757_s12 = scalar_lea.hbm %s851_s0, %s395_s8  ;;  %p37_p6 = scmp.eq.s32.totalorder %s36_s9, 0 }
  0x35   : > { %s764_s5 = scalar_lea.sflag [#allocation4], %s158_s2  ;;  %s519_s30 = scalar_lea.hbm %s757_s12, 1024 }
  0x36   : > { %s762_s26 = scalar_select %p37_p6, %s599_s16, %s39_s22  }
  0x37   : > { %p520_p8 = scmp.ne.s32.totalorder %s757_s12, %s519_s30  ;;  %p865_p11 = scmp.ne.s32.totalorder %s864_s29, 0 }
  0x38   : > { %s524_s6 = scalar_lea.hbm %s851_s0, 4096  ;;  %p525_p2 = scmp.lt.u32.totalorder %s757_s12, %s851_s0 }
  0x39   : > { %p521_p12 = pneg %p865_p11  ;;  %p526_p5 = scmp.lt.u32.totalorder %s524_s6, %s519_s30 }
  0x3a   : > { %p528_p7 = scmp.lt.u32.totalorder %s519_s30, %s757_s12 }
  0x3b   : > { %p522_p0 = pnand %p521_p12, %p520_p8  ;;  %p527_p4 = por %p526_p5, %p525_p2 }
  0x3d   : > { %p523_p1 = pneg %p522_p0  ;;  %p529_p9 = por %p528_p7, %p527_p4 }
  0x3f   : > { %p530_p10 = pnand %p529_p9, %p523_p1 }
  0x41   : > { %533 = shalt.err (!%p530_p10)
}
  0x42   : > { %s534_s22 = scalar_lea.vmem %s750_s27, 1024  ;;  %s622_s2 = smov [#allocation3]  }
  0x43   : > { %p535_p13 = scmp.ne.s32.totalorder %s750_s27, %s534_s22  ;;  %s539_s9 = sshll.u32 %s622_s2, 4  ;;  %s540_s9 = int_to_ptr.vmem [resolvable:$false] %s539_s9 }
  0x44   : > { %s541_s10 = scalar_lea.vmem %s540_s9, 2048  ;;  %p542_p8 = scmp.lt.s32.totalorder %s750_s27, %s540_s9 }
  0x45   : > { %p537_p3 = pnand %p535_p13, %p521_p12  ;;  %p543_p0 = scmp.lt.s32.totalorder %s541_s10, %s534_s22 }
  0x47   : > { %p538_p6 = pneg %p537_p3  ;;  %p544_p2 = por %p543_p0, %p542_p8 }
  0x49   : > { %p545_p5 = pnand %p544_p2, %p538_p6 }
  0x4b   : > { %548 = shalt.err (!%p545_p5)
}
  0x4c   : > { %s623_s11 = smov 1024   ;;  %s624_s30 = smov 512  }
  0x4d   : > { %s625_s28 = smov 32   ;;  %p866_p12 = scmp.ne.s32.totalorder %s862_s25, 0 }
  0x4e   : > { %419 = dma.hbm_to_vmem [thread:$0]  (!%p865_p11), %s757_s12, 1024, %s750_s27, %s764_s5, %s623_s11, %s624_s30, %s625_s28  }
  0x4f   : > { %184 = sbr.rel (%p866_p12) target bundleno = 264 (0x108), region = 32  ;;  %s186_s4 = sand.u32 (!%p866_p12), 1, %s595_s15  }
  0x50   : > { %s397_s6 = sshll.u32 (!%p866_p12), %s186_s4, 6  ;;  %s187_s7 = scalar_lea.sflag (!%p866_p12), [#allocation4], %s186_s4 }
  0x51   : > { %s795_s8 = scalar_lea.vmem (!%p866_p12), [#allocation3], %s397_s6  ;;  %p867_p1 = scmp.ne.s32.totalorder (!%p866_p12), %s861_s24, 0 }
  0x56   : > { %582 = dma.done.wait (%p867_p1), %s187_s7, 1024  }
  0x57   : > { %584 = vsyncadd (%p867_p1), %s187_s7, 4294966272  ;;  %p868_p4 = scmp.ne.s32.totalorder %s860_s23, 0 }
  0x59   : > { %586 = dma.done.wait (%p868_p4), [#allocation6], 128  }
  0x5a   : > { %588 = vsyncadd (%p868_p4), [#allocation6], 4294967168  ;;  %s399_s25 = sshll.u32 %s607_s18, 1  ;;  %p401_p7 = scmp.ne.s32.totalorder %s603_s17, 0 }
  0x5b   : > { %p220_p11 = scmp.lt.s32.totalorder %s399_s25, 3  ;;  %s229_s24 = sld [smem:[#allocation2]] (!%p401_p7)  ;;  %vm231_vm0 = vcmask (!%p401_p7), 7168  }
  0x5c   : > { %228 = sbr.rel (%p401_p7) target bundleno = 99 (0x63), region = 44 }
  0x5d   : > { %s884_s25 = smov (!%p220_p11, %s399_s25), 3 }
  0x5e   : > { %s400_s29 = sshll.u32 %s884_s25, 3 }
  0x5f   : > { %s809_s5 = scalar_lea.vmem %s854_s3, %s400_s29 }
  0x61   : > { %v230_v0 = vstv (!%p401_p7), %s229_s24 }
  0x62   : > { %232 = vst.msk [vmem:[%s809_s5] sm:$0xff] (!%p401_p7), %vm231_vm0, %v230_v0  ;;  %233 = vst.msk [vmem:[%s809_s5 + $0x8] sm:$0xff] (!%p401_p7), %vm231_vm0, %v230_v0 }
  0x63 PF: > { %s402_s18 = sshll.u32 %s603_s17, 9  ;;  %v248_v1 = vlaneseq  ;;  %v239_v8 = vld [vmem:[%s795_s8] sm:$0xff]  ;;  %v240_v9 = vld [vmem:[%s795_s8 + $0x8] sm:$0xff]  ;;  %v241_v10 = vld [vmem:[%s795_s8 + $0x10] sm:$0xff]  ;;  %vm290_vm1 = vcmask 7168  }
  0x64   : > { %s235_s23 = sshra.s32 %s402_s18, 7  ;;  %v243_v15 = vld [vmem:[%s795_s8 + $0x20] sm:$0xff]  ;;  %v244_v16 = vld [vmem:[%s795_s8 + $0x28] sm:$0xff]  ;;  %v245_v17 = vld [vmem:[%s795_s8 + $0x30] sm:$0xff] }
  0x65   : > { %v249_v2 = vshrl.u32 %v248_v1, 7  ;;  %s237_s22 = scalar_lea.vmem [#allocation5], %s235_s23  ;;  %v242_v18 = vld [vmem:[%s795_s8 + $0x18] sm:$0xff] }
  0x66   : > { %v238_v3 = vld [vmem:[%s237_s22] sm:$0xf]  ;;  %v246_v22 = vld [vmem:[%s795_s8 + $0x38] sm:$0xff] }
  0x67   : > { %v250_v4 = vsub.s32 0, %v249_v2  ;;  %v254_v5 = vsub.s32 1, %v249_v2  ;;  %v258_v6 = vsub.s32 2, %v249_v2  ;;  %v262_v7 = vsub.s32 3, %v249_v2 }
  0x69   : > { %v251_v11 = vrot.slane %v238_v3, %v250_v4  ;;  %v255_v12 = vrot.slane %v238_v3, %v254_v5  ;;  %v259_v13 = vrot.slane %v238_v3, %v258_v6  ;;  %v263_v14 = vrot.slane %v238_v3, %v262_v7  ;;  %v276_v34 = vld [vmem:[%s809_s5] sm:$0xff]  ;;  %v277_v36 = vld [vmem:[%s809_s5 + $0x8] sm:$0xff] }
  0x6b   : > { %v268_v19 = vmul.f32 %v251_v11, %v239_v8  ;;  %v269_v20 = vmul.f32 %v255_v12, %v240_v9  ;;  %v270_v21 = vmul.f32 %v259_v13, %v241_v10  ;;  %v272_v23 = vmul.f32 %v251_v11, %v243_v15 }
  0x6c   : > { %v273_v24 = vmul.f32 %v255_v12, %v244_v16  ;;  %v274_v25 = vmul.f32 %v259_v13, %v245_v17  ;;  %v271_v26 = vmul.f32 %v263_v14, %v242_v18  ;;  %v275_v30 = vmul.f32 %v263_v14, %v246_v22 }
  0x6d   : > { %v278_v27 = vadd.f32 %v269_v20, %v268_v19 }
  0x6e   : > { %v283_v28 = vadd.f32 %v273_v24, %v272_v23 }
  0x6f   : > { %v279_v29 = vadd.f32 %v278_v27, %v270_v21 }
  0x70   : > { %v284_v31 = vadd.f32 %v283_v28, %v274_v25 }
  0x71   : > { %v280_v32 = vadd.f32 %v279_v29, %v271_v26 }
  0x72   : > { %v285_v33 = vadd.f32 %v284_v31, %v275_v30 }
  0x73   : > { %281 = vadd.xlane.f32.xlu0 %v280_v32 }
  0x77   : > { %286 = vadd.xlane.f32.xlu0 %v285_v33 }
 0x100   : > { %v282_v35 = vpop.xlane.xlu0 %281 }
 0x101   : > { %v288_v37 = vadd.f32 %v282_v35, %v276_v34 }
 0x103   : > { %291 = vst.msk [vmem:[%s809_s5] sm:$0xff] %vm290_vm1, %v288_v37 }
 0x104   : > { %v287_v38 = vpop.xlane.xlu0 %286 }
 0x105   : > { %v289_v39 = vadd.f32 %v287_v38, %v277_v36 }
 0x107   : > { %292 = vst.msk [vmem:[%s809_s5 + $0x8] sm:$0xff] %vm290_vm1, %v289_v39 }
 0x108 PF: > { %s18_s21 = sadd.s32 1, %s619_s21   ;;  %s869_s2 = smov %s882_s14 }
 0x109   : > { %p15_p9 = scmp.ge.s32.totalorder %s18_s21, 6   ;;  %s870_s14 = smov %s595_s15 }
 0x10a   : > { %s871_s15 = smov %s599_s16  ;;  %s872_s16 = smov %s762_s26 }
 0x10b   : > { %s873_s17 = smov %s611_s19  ;;  %s874_s18 = smov %s615_s20 }
 0x10c   : > { %s875_s19 = smov %s878_s13  ;;  %s876_s20 = smov %s869_s2 }
 0x10d   :  { %17 = sbr.rel (!%p15_p9) target bundleno = 8 (0x8), region = 81 }
 0x114   :  { %315 = vsyncpa [#allocation4], 1 }
 0x115   :  { %317 = vsyncpa [#allocation4 + $0x1], 1 }
 0x116   :  { %318 = vsyncpa [#allocation6], 1 }

</bundles_post_ra>
